<compile_context>
chip_gen: v7x
topology: tpu7x:2x2x1
jax: 0.10.0
libtpu: 0.0.40
codegen_flags: <defaults>
</compile_context>

<pallas_src>
import functools
import math

import jax
import jax.numpy as jnp
from jax import lax
from jax.experimental import pallas as pl
from jax.experimental.pallas import tpu as pltpu


def _contrastive_kernel(t_all_ref, f_blk_ref, o_ref, pos_acc_ref, rep_acc_ref,
                        *, scale, batch, tn):
    """One column block (tn columns of the B x B kernel matrices) per grid step.

    pos_acc: sum_i K(features_i, targets_i)                     (attraction diag)
    rep_acc: sum_{i != j} K(targets_i, features_j) + K(targets_i, targets_j)
    """
    j = pl.program_id(0)

    @pl.when(j == 0)
    def _init():
        pos_acc_ref[...] = jnp.zeros_like(pos_acc_ref)
        rep_acc_ref[...] = jnp.zeros_like(rep_acc_ref)

    # Fold 1/(2 sigma^2) into the inputs once: with s = 1/(sqrt(2)*sigma),
    # ||s*x - s*y||^2 == ||x - y||^2 / (2 sigma^2), so every squared distance
    # below is already the exp argument.
    t_all = t_all_ref[...].astype(jnp.float32) * scale                   # (B, D)
    f_blk = f_blk_ref[...].astype(jnp.float32) * scale                   # (TN, D)
    col0 = pl.multiple_of(j * tn, tn)
    t_blk = t_all_ref[pl.ds(col0, tn), :].astype(jnp.float32) * scale    # (TN, D)

    # Attraction diagonal computed directly from (f - t): avoids the
    # catastrophic cancellation of the norm identity when f_i ~= t_i, and needs
    # no B x B iota / where selection.
    diff = f_blk - t_blk
    pos_blk = jnp.sum(jnp.exp(-jnp.sum(diff * diff, axis=1, keepdims=True)),
                      keepdims=True)                                      # (1, 1)

    # Row-wise squared norms (already in scaled space).
    t_all_n = jnp.sum(t_all * t_all, axis=1, keepdims=True)               # (B, 1)
    f_blk_n = jnp.sum(f_blk * f_blk, axis=1, keepdims=True)               # (TN, 1)
    t_blk_n = jnp.sum(t_blk * t_blk, axis=1, keepdims=True)               # (TN, 1)

    # Contract D of both operands -> MXU consumes (B, D) x (TN, D) directly,
    # no explicit transpose of the column operand.
    nt_dims = (((1,), (1,)), ((), ()))

    # K(targets_i, features_j): build and fully reduce before K(targets, targets).
    g_tf = lax.dot_general(t_all, f_blk, nt_dims,
                           preferred_element_type=jnp.float32)            # (B, TN)
    d_tf = jnp.maximum(t_all_n + f_blk_n.T - 2.0 * g_tf, 0.0)             # clamp >= 0
    sum_tf = jnp.sum(jnp.exp(-d_tf), keepdims=True)                       # (1, 1)

    # K(targets_i, targets_j)
    g_tt = lax.dot_general(t_all, t_blk, nt_dims,
                           preferred_element_type=jnp.float32)            # (B, TN)
    d_tt = jnp.maximum(t_all_n + t_blk_n.T - 2.0 * g_tt, 0.0)
    sum_tt = jnp.sum(jnp.exp(-d_tt), keepdims=True)                       # (1, 1)

    # Sum-minus-trace instead of diagonal masks: the diagonal entries of the
    # full B x B matrices that fall inside this column block sit at rows
    # j*tn + c.  For K(t, f) they equal the directly-computed pos values; for
    # K(t, t) they are exactly tn ones.
    pos_acc_ref[...] += pos_blk
    rep_acc_ref[...] += (sum_tf - pos_blk) + (sum_tt - jnp.float32(tn))

    @pl.when(j == pl.num_programs(0) - 1)
    def _finalize():
        attraction = 1.0 - pos_acc_ref[...] / jnp.float32(batch)
        # NB: batch == 1 divides by zero, matching the PyTorch reference.
        repulsion = rep_acc_ref[...] / jnp.float32(batch * (batch - 1))
        o_ref[...] = attraction + repulsion


def _pick_col_tile(batch):
    """Column tile for the B x B kernel matrices.

    Sized so the live (B, TN) f32 Gram/exp tile plus the resident (B, D) inputs
    stay comfortably inside scoped VMEM even on v7x (64 MiB physical): at most
    512 columns per step.
    """
    if batch <= 512:
        return batch
    for tn in (512, 256, 128, 64, 32, 16, 8):
        if batch % tn == 0:
            return tn
    # TODO(synk): pad ragged batch sizes to a multiple of 8 and mask the tail
    # columns instead of falling back to a single (possibly VMEM-heavy) block.
    return batch


def custom_contrastive_loss(features, targets, sigma):
    """Pallas equivalent of CustomContrastiveLoss(sigma)(features, targets).

    features, targets: (B, D) float32.  Returns a scalar float32 loss (the
    PyTorch module returns a shape-(1,) tensor; the value is identical).
    """
    assert features.shape == targets.shape and features.ndim == 2
    B, D = features.shape
    tn = _pick_col_tile(B)
    num_blocks = B // tn if B % tn == 0 else 1
    if B % tn != 0:
        tn = B

    kernel = functools.partial(
        _contrastive_kernel,
        scale=1.0 / (math.sqrt(2.0) * float(sigma)),
        batch=B,
        tn=tn,
    )
    out = pl.pallas_call(
        kernel,
        out_shape=jax.ShapeDtypeStruct((1, 1), jnp.float32),
        grid=(num_blocks,),
        in_specs=[
            # Full targets: same block every step -> stays resident in VMEM.
            pl.BlockSpec((B, D), lambda j: (0, 0)),
            # Column block of features for this grid step.
            pl.BlockSpec((tn, D), lambda j: (j, 0)),
        ],
        out_specs=pl.BlockSpec((1, 1), lambda j: (0, 0)),
        scratch_shapes=[
            pltpu.VMEM((1, 1), jnp.float32),   # pos_acc
            pltpu.VMEM((1, 1), jnp.float32),   # rep_acc
        ],
        compiler_params=pltpu.CompilerParams(
            # The column axis accumulates into shared scratch -> "arbitrary".
            dimension_semantics=("arbitrary",),
        ),
    )(targets, features)
    return out[0, 0]


def _reference_loss(features, targets, sigma):
    """Pure-JAX reference mirroring the PyTorch loop semantics."""
    def gk(x, y):
        return jnp.exp(-jnp.sum((x - y) ** 2, axis=-1) / (2.0 * sigma ** 2))

    B = features.shape[0]
    attraction = 1.0 - jnp.mean(gk(features, targets))
    rep = 0.0
    for i in range(B):
        for j in range(B):
            if i != j:
                rep += gk(targets[i], features[j]) + gk(targets[i], targets[j])
    rep = rep / (B * (B - 1))
    return attraction + rep


if __name__ == "__main__":
    key = jax.random.PRNGKey(0)
    k1, k2 = jax.random.split(key)
    B, D = 8, 32
    sigma = 1.5

    features = jax.random.normal(k1, (B, D), dtype=jnp.float32)
    targets = jax.random.normal(k2, (B, D), dtype=jnp.float32)

    loss = custom_contrastive_loss(features, targets, sigma)
    loss = jax.block_until_ready(loss)

    ref = _reference_loss(features, targets, sigma)
    assert jnp.allclose(loss, ref, rtol=1e-4, atol=1e-5), (loss, ref)

    print("KERNEL_OK")
</pallas_src>

<mosaic_0001>
module attributes {stable_mosaic.version = 11 : i64} {
  func.func @_contrastive_kernel(%arg0: i32, %arg1: memref<8x32xf32, #tpu.memory_space<vmem>>, %arg2: memref<8x32xf32, #tpu.memory_space<vmem>>, %arg3: memref<1x1xf32, #tpu.memory_space<vmem>>, %arg4: memref<1x1xf32, #tpu.memory_space<vmem>>, %arg5: memref<1x1xf32, #tpu.memory_space<vmem>>) attributes {dimension_semantics = [#tpu.dimension_semantics<arbitrary>], iteration_bounds = array<i64: 1>, scalar_prefetch = 0 : i64, scratch_operands = 2 : i64, tpu.core_type = #tpu.core_type<tc>, window_params = [{pipeline_mode = #tpu.pipeline_mode<synchronous>, transform_indices = @transform_0, window_bounds = array<i64: 8, 32>}, {transform_indices = @transform_1, window_bounds = array<i64: 8, 32>}, {pipeline_mode = #tpu.pipeline_mode<synchronous>, transform_indices = @transform_2, window_bounds = array<i64: 1, 1>}]} {
    %c0_i32 = arith.constant 0 : i32
    %0 = arith.cmpi eq, %arg0, %c0_i32 : i32
    %1 = arith.extui %0 : i1 to i32
    %c0_i32_0 = arith.constant 0 : i32
    %2 = arith.cmpi ne, %1, %c0_i32_0 : i32
    scf.if %2 {
      %cst_34 = arith.constant 0.000000e+00 : f32
      %85 = vector.broadcast %cst_34 : f32 to vector<1x1xf32>
      %c0_35 = arith.constant 0 : index
      %c0_36 = arith.constant 0 : index
      %86 = vector.load %arg4[%c0_35, %c0_36] : memref<1x1xf32, #tpu.memory_space<vmem>>, vector<1x1xf32>
      tpu.vector_store %arg4[%c0_35, %c0_36], %85 {strides = array<i32>} : memref<1x1xf32, #tpu.memory_space<vmem>>, vector<1x1xf32>,
      %cst_37 = arith.constant 0.000000e+00 : f32
      %87 = vector.broadcast %cst_37 : f32 to vector<1x1xf32>
      %c0_38 = arith.constant 0 : index
      %c0_39 = arith.constant 0 : index
      %88 = vector.load %arg5[%c0_38, %c0_39] : memref<1x1xf32, #tpu.memory_space<vmem>>, vector<1x1xf32>
      tpu.vector_store %arg5[%c0_38, %c0_39], %87 {strides = array<i32>} : memref<1x1xf32, #tpu.memory_space<vmem>>, vector<1x1xf32>,
    } else {
    }
    %c0 = arith.constant 0 : index
    %c0_1 = arith.constant 0 : index
    %3 = vector.load %arg1[%c0, %c0_1] : memref<8x32xf32, #tpu.memory_space<vmem>>, vector<8x32xf32>
    %cst = arith.constant 0.471404523 : f32
    %4 = vector.broadcast %cst : f32 to vector<8x32xf32>
    %5 = arith.mulf %3, %4 : vector<8x32xf32>
    %c0_2 = arith.constant 0 : index
    %c0_3 = arith.constant 0 : index
    %6 = vector.load %arg2[%c0_2, %c0_3] : memref<8x32xf32, #tpu.memory_space<vmem>>, vector<8x32xf32>
    %cst_4 = arith.constant 0.471404523 : f32
    %7 = vector.broadcast %cst_4 : f32 to vector<8x32xf32>
    %8 = arith.mulf %6, %7 : vector<8x32xf32>
    %c8_i32 = arith.constant 8 : i32
    %9 = arith.muli %arg0, %c8_i32 : i32
    %10 = tpu.assume_multiple %9, 8 : i32
    %11 = arith.index_cast %10 : i32 to index
    %c0_5 = arith.constant 0 : index
    %12 = vector.load %arg1[%11, %c0_5] : memref<8x32xf32, #tpu.memory_space<vmem>>, vector<8x32xf32>
    %cst_6 = arith.constant 0.471404523 : f32
    %13 = vector.broadcast %cst_6 : f32 to vector<8x32xf32>
    %14 = arith.mulf %12, %13 : vector<8x32xf32>
    %15 = arith.subf %8, %14 : vector<8x32xf32>
    %16 = arith.mulf %15, %15 : vector<8x32xf32>
    %cst_7 = arith.constant dense<0.000000e+00> : vector<8xf32>
    %17 = vector.multi_reduction <add>, %16, %cst_7 [1] : vector<8x32xf32> to vector<8xf32>
    %18 = vector.shape_cast %17 : vector<8xf32> to vector<8x1xf32>
    %cst_8 = arith.constant 0.000000e+00 : f32
    %19 = vector.broadcast %cst_8 : f32 to vector<8x1xf32>
    %20 = arith.subf %19, %18 : vector<8x1xf32>
    %21 = math.exp %20 : vector<8x1xf32>
    %22 = vector.shape_cast %21 : vector<8x1xf32> to vector<1x8x1xf32>
    %cst_9 = arith.constant dense<0.000000e+00> : vector<1xf32>
    %23 = vector.multi_reduction <add>, %22, %cst_9 [1, 2] : vector<1x8x1xf32> to vector<1xf32>
    %24 = vector.shape_cast %23 : vector<1xf32> to vector<1x1x1xf32>
    %25 = vector.extract %24[0, 0, 0] : f32 from vector<1x1x1xf32>
    %26 = vector.broadcast %25 : f32 to vector<1x1xf32>
    %27 = arith.mulf %5, %5 : vector<8x32xf32>
    %cst_10 = arith.constant dense<0.000000e+00> : vector<8xf32>
    %28 = vector.multi_reduction <add>, %27, %cst_10 [1] : vector<8x32xf32> to vector<8xf32>
    %29 = vector.shape_cast %28 : vector<8xf32> to vector<8x1xf32>
    %30 = arith.mulf %8, %8 : vector<8x32xf32>
    %cst_11 = arith.constant dense<0.000000e+00> : vector<8xf32>
    %31 = vector.multi_reduction <add>, %30, %cst_11 [1] : vector<8x32xf32> to vector<8xf32>
    %32 = vector.shape_cast %31 : vector<8xf32> to vector<8x1xf32>
    %33 = arith.mulf %14, %14 : vector<8x32xf32>
    %cst_12 = arith.constant dense<0.000000e+00> : vector<8xf32>
    %34 = vector.multi_reduction <add>, %33, %cst_12 [1] : vector<8x32xf32> to vector<8xf32>
    %35 = vector.shape_cast %34 : vector<8xf32> to vector<8x1xf32>
    %cst_13 = arith.constant dense<0.000000e+00> : vector<8x8xf32>
    %36 = tpu.matmul %5, %8, %cst_13 {dimension_numbers = #tpu.dot_dimension_numbers<[1], [1], [0], [0], [0, 0, 1, 0], [], []>} : vector<8x32xf32>, vector<8x32xf32>, vector<8x8xf32> -> vector<8x8xf32>
    %37 = tpu.transpose %32, [1, 0] : vector<8x1xf32> -> vector<1x8xf32>
    %38 = vector.broadcast %29 : vector<8x1xf32> to vector<8x8xf32>
    %39 = vector.broadcast %37 : vector<1x8xf32> to vector<8x8xf32>
    %40 = arith.addf %38, %39 : vector<8x8xf32>
    %cst_14 = arith.constant 2.000000e+00 : f32
    %41 = vector.broadcast %cst_14 : f32 to vector<8x8xf32>
    %42 = arith.mulf %41, %36 : vector<8x8xf32>
    %43 = arith.subf %40, %42 : vector<8x8xf32>
    %cst_15 = arith.constant 0.000000e+00 : f32
    %44 = vector.broadcast %cst_15 : f32 to vector<8x8xf32>
    %45 = arith.maximumf %43, %44 : vector<8x8xf32>
    %cst_16 = arith.constant 0.000000e+00 : f32
    %46 = vector.broadcast %cst_16 : f32 to vector<8x8xf32>
    %47 = arith.subf %46, %45 : vector<8x8xf32>
    %48 = math.exp %47 : vector<8x8xf32>
    %49 = vector.shape_cast %48 : vector<8x8xf32> to vector<1x8x8xf32>
    %cst_17 = arith.constant dense<0.000000e+00> : vector<1xf32>
    %50 = vector.multi_reduction <add>, %49, %cst_17 [1, 2] : vector<1x8x8xf32> to vector<1xf32>
    %51 = vector.shape_cast %50 : vector<1xf32> to vector<1x1x1xf32>
    %52 = vector.extract %51[0, 0, 0] : f32 from vector<1x1x1xf32>
    %53 = vector.broadcast %52 : f32 to vector<1x1xf32>
    %cst_18 = arith.constant dense<0.000000e+00> : vector<8x8xf32>
    %54 = tpu.matmul %5, %14, %cst_18 {dimension_numbers = #tpu.dot_dimension_numbers<[1], [1], [0], [0], [0, 0, 1, 0], [], []>} : vector<8x32xf32>, vector<8x32xf32>, vector<8x8xf32> -> vector<8x8xf32>
    %55 = tpu.transpose %35, [1, 0] : vector<8x1xf32> -> vector<1x8xf32>
    %56 = vector.broadcast %29 : vector<8x1xf32> to vector<8x8xf32>
    %57 = vector.broadcast %55 : vector<1x8xf32> to vector<8x8xf32>
    %58 = arith.addf %56, %57 : vector<8x8xf32>
    %cst_19 = arith.constant 2.000000e+00 : f32
    %59 = vector.broadcast %cst_19 : f32 to vector<8x8xf32>
    %60 = arith.mulf %59, %54 : vector<8x8xf32>
    %61 = arith.subf %58, %60 : vector<8x8xf32>
    %cst_20 = arith.constant 0.000000e+00 : f32
    %62 = vector.broadcast %cst_20 : f32 to vector<8x8xf32>
    %63 = arith.maximumf %61, %62 : vector<8x8xf32>
    %cst_21 = arith.constant 0.000000e+00 : f32
    %64 = vector.broadcast %cst_21 : f32 to vector<8x8xf32>
    %65 = arith.subf %64, %63 : vector<8x8xf32>
    %66 = math.exp %65 : vector<8x8xf32>
    %67 = vector.shape_cast %66 : vector<8x8xf32> to vector<1x8x8xf32>
    %cst_22 = arith.constant dense<0.000000e+00> : vector<1xf32>
    %68 = vector.multi_reduction <add>, %67, %cst_22 [1, 2] : vector<1x8x8xf32> to vector<1xf32>
    %69 = vector.shape_cast %68 : vector<1xf32> to vector<1x1x1xf32>
    %70 = vector.extract %69[0, 0, 0] : f32 from vector<1x1x1xf32>
    %71 = vector.broadcast %70 : f32 to vector<1x1xf32>
    %c0_23 = arith.constant 0 : index
    %c0_24 = arith.constant 0 : index
    %72 = vector.load %arg4[%c0_23, %c0_24] : memref<1x1xf32, #tpu.memory_space<vmem>>, vector<1x1xf32>
    %73 = arith.addf %72, %26 : vector<1x1xf32>
    %c0_25 = arith.constant 0 : index
    %c0_26 = arith.constant 0 : index
    %74 = vector.load %arg4[%c0_25, %c0_26] : memref<1x1xf32, #tpu.memory_space<vmem>>, vector<1x1xf32>
    tpu.vector_store %arg4[%c0_25, %c0_26], %73 {strides = array<i32>} : memref<1x1xf32, #tpu.memory_space<vmem>>, vector<1x1xf32>,
    %c0_27 = arith.constant 0 : index
    %c0_28 = arith.constant 0 : index
    %75 = vector.load %arg5[%c0_27, %c0_28] : memref<1x1xf32, #tpu.memory_space<vmem>>, vector<1x1xf32>
    %76 = arith.subf %53, %26 : vector<1x1xf32>
    %cst_29 = arith.constant 8.000000e+00 : f32
    %77 = vector.broadcast %cst_29 : f32 to vector<1x1xf32>
    %78 = arith.subf %71, %77 : vector<1x1xf32>
    %79 = arith.addf %76, %78 : vector<1x1xf32>
    %80 = arith.addf %75, %79 : vector<1x1xf32>
    %c0_30 = arith.constant 0 : index
    %c0_31 = arith.constant 0 : index
    %81 = vector.load %arg5[%c0_30, %c0_31] : memref<1x1xf32, #tpu.memory_space<vmem>>, vector<1x1xf32>
    tpu.vector_store %arg5[%c0_30, %c0_31], %80 {strides = array<i32>} : memref<1x1xf32, #tpu.memory_space<vmem>>, vector<1x1xf32>,
    %c0_i32_32 = arith.constant 0 : i32
    %82 = arith.cmpi eq, %arg0, %c0_i32_32 : i32
    %83 = arith.extui %82 : i1 to i32
    %c0_i32_33 = arith.constant 0 : i32
    %84 = arith.cmpi ne, %83, %c0_i32_33 : i32
    scf.if %84 {
      %c0_34 = arith.constant 0 : index
      %c0_35 = arith.constant 0 : index
      %85 = vector.load %arg4[%c0_34, %c0_35] : memref<1x1xf32, #tpu.memory_space<vmem>>, vector<1x1xf32>
      %cst_36 = arith.constant 8.000000e+00 : f32
      %86 = vector.broadcast %cst_36 : f32 to vector<1x1xf32>
      %87 = arith.divf %85, %86 : vector<1x1xf32>
      %cst_37 = arith.constant 1.000000e+00 : f32
      %88 = vector.broadcast %cst_37 : f32 to vector<1x1xf32>
      %89 = arith.subf %88, %87 : vector<1x1xf32>
      %c0_38 = arith.constant 0 : index
      %c0_39 = arith.constant 0 : index
      %90 = vector.load %arg5[%c0_38, %c0_39] : memref<1x1xf32, #tpu.memory_space<vmem>>, vector<1x1xf32>
      %cst_40 = arith.constant 5.600000e+01 : f32
      %91 = vector.broadcast %cst_40 : f32 to vector<1x1xf32>
      %92 = arith.divf %90, %91 : vector<1x1xf32>
      %93 = arith.addf %89, %92 : vector<1x1xf32>
      %c0_41 = arith.constant 0 : index
      %c0_42 = arith.constant 0 : index
      %94 = vector.load %arg3[%c0_41, %c0_42] : memref<1x1xf32, #tpu.memory_space<vmem>>, vector<1x1xf32>
      tpu.vector_store %arg3[%c0_41, %c0_42], %93 {strides = array<i32>} : memref<1x1xf32, #tpu.memory_space<vmem>>, vector<1x1xf32>,
    } else {
    }
    return
  }
  func.func @transform_0(%arg0: i32) -> (i32, i32) {
    %c0_i32 = arith.constant 0 : i32
    %c0_i32_0 = arith.constant 0 : i32
    %c0_i32_1 = arith.constant 0 : i32
    return %c0_i32, %c0_i32_0 : i32, i32
  }
  func.func @transform_1(%arg0: i32) -> (i32, i32) {
    %c0_i32 = arith.constant 0 : i32
    %c0_i32_0 = arith.constant 0 : i32
    return %arg0, %c0_i32 : i32, i32
  }
  func.func @transform_2(%arg0: i32) -> (i32, i32) {
    %c0_i32 = arith.constant 0 : i32
    %c0_i32_0 = arith.constant 0 : i32
    %c0_i32_1 = arith.constant 0 : i32
    return %c0_i32, %c0_i32_0 : i32, i32
  }
}

</mosaic_0001>

<bundles_post_ra>
// kernel: tpu_custom_call.1
= control target key start
LH: loop header
LB: loop body
LE: loop exit
PB: predicated region body
PF: predicated region fallthrough
CT: control target
= control target key end

     0   :  { %7 = vsyncpa [#allocation5], 0  ;;  %s555_s0 = inlined_call_operand.hbm [shape: f32[8,32], index: 0, kind: input, shape index: {}]   ;;  %s556_s1 = inlined_call_operand.hbm [shape: f32[8,32], index: 1, kind: input, shape index: {}]   ;;  %s557_s2 = inlined_call_operand.hbm [shape: f32[1,1], index: 2, kind: output, shape index: {}]  }
   0x1   :  { %8 = vsyncpa [#allocation8], 0 }
   0x2   :  { %9 = vsyncpa [#allocation6], 0  ;;  %s488_s9 = smov [#allocation4]   ;;  %s489_s11 = smov [#allocation7]  }
   0x3   :  { %s16_s10 = sshll.u32 %s488_s9, 4  ;;  %s26_s12 = sshll.u32 %s489_s11, 4  ;;  %s17_s10 = int_to_ptr.vmem [resolvable:$true] %s16_s10  ;;  %s27_s12 = int_to_ptr.vmem [resolvable:$true] %s26_s12 }
   0x4   :  { %s416_s15 = scalar_lea.hbm %s555_s0, 128 }
   0x5   :  { %p417_p0 = scmp.ne.s32.totalorder %s555_s0, %s416_s15  ;;  %p420_p1 = scmp.lt.u32.totalorder %s416_s15, %s555_s0 }
   0x7   :  { %p422_p2 = pnand %p420_p1, %p417_p0 }
   0x9   :  { %425 = shalt.err (!%p422_p2)
}
   0xa   :  { %s426_s20 = scalar_lea.vmem %s17_s10, 128  ;;  %p431_p4 = scmp.lt.s32.totalorder %s17_s10, %s17_s10 }
   0xb   :  { %p427_p3 = scmp.ne.s32.totalorder %s17_s10, %s426_s20  ;;  %p432_p5 = scmp.lt.s32.totalorder %s426_s20, %s426_s20 }
   0xd   :  { %p433_p6 = por %p432_p5, %p431_p4 }
   0xf   :  { %p434_p7 = pnand %p433_p6, %p427_p3 }
  0x11   :  { %437 = shalt.err (!%p434_p7)
}
  0x12   :  { %19 = dma.hbm_to_vmem [thread:$0]  %s555_s0, 128, %s17_s10, [#allocation5]  }
  0x13   :  { %s438_s25 = scalar_lea.hbm %s556_s1, 128 }
  0x14   :  { %p439_p8 = scmp.ne.s32.totalorder %s556_s1, %s438_s25  ;;  %p442_p9 = scmp.lt.u32.totalorder %s438_s25, %s556_s1 }
  0x16   :  { %p444_p10 = pnand %p442_p9, %p439_p8 }
  0x18   :  { %447 = shalt.err (!%p444_p10)
}
  0x19   :  { %s448_s30 = scalar_lea.vmem %s27_s12, 128  ;;  %p453_p12 = scmp.lt.s32.totalorder %s27_s12, %s27_s12 }
  0x1a   :  { %p449_p11 = scmp.ne.s32.totalorder %s27_s12, %s448_s30  ;;  %p454_p13 = scmp.lt.s32.totalorder %s448_s30, %s448_s30 }
  0x1c   :  { %p455_p0 = por %p454_p13, %p453_p12 }
  0x1e   :  { %p456_p1 = pnand %p455_p0, %p449_p11 }
  0x20   :  { %459 = shalt.err (!%p456_p1)
}
  0x21   :  { %29 = dma.hbm_to_vmem [thread:$0]  %s556_s1, 128, %s27_s12, [#allocation8]  }
  0x22   :  { %482 = dma.done.wait [#allocation5], 128  }
  0x23   :  { %483 = vsyncadd [#allocation5], 4294967168 }
  0x24   :  { %484 = dma.done.wait [#allocation8], 128  }
  0x25   :  { %485 = vsyncadd [#allocation8], 4294967168  ;;  %v490_v0 = vmov 0.0   ;;  %vm491_vm0 = vmmov 0   ;;  %v45_v1 = vld [vmem:[#allocation7] sm:$0xff]  ;;  %v49_v2 = vld [vmem:[#allocation4] sm:$0xff]  ;;  %v192_v24 = vlaneseq }
  0x26   :  { %389 = vmatprep.subr.mxu0 %v490_v0  ;;  %391 = vmatprep.mubr.msk.f32.mxu0 %vm491_vm0, %v490_v0  ;;  %v46_v3 = vmul.f32 0.47140452, %v45_v1  ;;  %v50_v4 = vmul.f32 0.47140452, %v49_v2  ;;  %vm53_vm1 = vcmask 261120   ;;  %vm60_vm2 = vcmask 7168  }
  0x27   :  { %394 = vmatprep.subr.mxu1 %v490_v0  ;;  %396 = vmatprep.mubr.msk.f32.mxu1 %vm491_vm0, %v490_v0  ;;  %v193_v25 = vshrl.u32 %v192_v24, 7  ;;  %vm203_vm3 = vcmask 64512   ;;  %vm40_vm4 = vcmask 0   ;;  %s492_s6 = smov [#allocation9]  }
  0x28   :  { %v76_v5 = vmul.f32 %v46_v3, %v46_v3  ;;  %v80_v6 = vmul.f32 %v50_v4, %v50_v4  ;;  %390 = vmatpush3.xpose.msk.msra.mxu0 %vm53_vm1, %v46_v3  ;;  %395 = vmatpush3.xpose.msk.msra.mxu1 %vm53_vm1, %v50_v4  ;;  %v51_v7 = vsub.f32 %v46_v3, %v50_v4  ;;  %s370_s7 = sshll.u32 %s492_s6, 4  ;;  %s371_s7 = int_to_ptr.vmem [resolvable:$true] %s370_s7 }
  0x29   :  { %v194_v26 = vsub.s32 0, %v193_v25  ;;  %41 = vst.msk [vmem:[#allocation2] sm:$0x1] %vm40_vm4, %v490_v0  ;;  %42 = vst.msk [vmem:[#allocation3] sm:$0x1] %vm40_vm4, %v490_v0  ;;  %s460_s8 = scalar_lea.vmem %s371_s7, 16  ;;  %p465_p3 = scmp.lt.s32.totalorder %s371_s7, %s371_s7 }
  0x2a   :  { %v77_v8 = vsel %vm53_vm1, %v76_v5, 0.0  ;;  %v52_v9 = vmul.f32 %v51_v7, %v51_v7  ;;  %v81_v10 = vsel %vm53_vm1, %v80_v6, 0.0  ;;  %p461_p2 = scmp.ne.s32.totalorder %s371_s7, %s460_s8  ;;  %s464_s9 = scalar_lea.vmem %s371_s7, 32 }
  0x2b   :  { %78 = vadd.xlane.f32.xlu0 %v77_v8  ;;  %392 = vmatmul.mubr.msk.f32.vlgmr.msra.gmra.mrb[0].mxu0 %vm53_vm1, %v50_v4  ;;  %p466_p4 = scmp.lt.s32.totalorder %s464_s9, %s460_s8 }
  0x2c   :  { %397 = vmatmul.mubr.msk.f32.vlgmr.msra.gmra.mrb[0].mxu1 %vm53_vm1, %v50_v4  ;;  %74 = vadd.xlane.f32.xlu1 %v81_v10  ;;  %v54_v11 = vsel %vm53_vm1, %v52_v9, 0.0 }
  0x2d   :  { %p467_p5 = por %p466_p4, %p465_p3 }
  0x2f   :  { %82 = vadd.xlane.f32.xlu0 %v81_v10  ;;  %p468_p6 = pnand %p467_p5, %p461_p2 }
  0x30   :  { %55 = vadd.xlane.f32.xlu1 %v54_v11  ;;  %v342_v54 = vld [vmem:[#allocation2] sm:$0x1]  ;;  %v346_v11 = vld [vmem:[#allocation3] sm:$0x1] }
  0xb8   :  { %v79_v12 = vpop.xlane.xlu0 %78 }
  0xb9   :  { %160 = vxpose.xlu0.b32.start.end [1/1] (short) (narrow) %v79_v12, 8  ;;  %v75_v14 = vpop.xlane.xlu1 %74 }
  0xbc   :  { %v83_v13 = vpop.xlane.xlu0 %82 }
  0xbd   :  { %288 = vxpose.xlu1.b32.start.end [1/1] (short) (narrow) %v83_v13, 8  ;;  %v56_v15 = vpop.xlane.xlu1 %55 }
  0xbe   :  { %v57_v16 = vsub.f32 0.0, %v56_v15 }
  0xc0   :  { %v58_v17 = vmul.f32 1.442695, %v57_v16 }
  0xc2   :  { %410 = vpow2.f32 %v58_v17 }
  0xcc   :  { %v411_v18 = vpop.eup %410 }
  0xcd   :  { %v61_v19 = vsel %vm60_vm2, %v411_v18, 0.0 }
  0xe6   :  { %62 = vadd.xlane.f32.xlu0 %v61_v19 }
  0xfe   :  { %v156_v20 = vpop.f32.mrb[0].mxu0 }
  0xff   :  { %v284_v21 = vpop.f32.mrb[0].mxu1  ;;  %v393_v22 = vpop.f32.mrb[1].mxu0  ;;  %v197_v29 = vmul.f32 2.0, %v156_v20 }
 0x100   :  { %v398_v23 = vpop.f32.mrb[1].mxu1  ;;  %v325_v34 = vmul.f32 2.0, %v284_v21 }
 0x139   :  { %v176_v27 = vpop.trf.xlu0 }
 0x13a   :  { %v195_v28 = vrot.slane %v176_v27, %v194_v26 }
 0x13c   :  { %v196_v30 = vadd.f32 %v195_v28, %v75_v14 }
 0x13d   :  { %v304_v31 = vpop.trf.xlu1 }
 0x13e   :  { %v198_v32 = vsub.f32 %v196_v30, %v197_v29  ;;  %v323_v33 = vrot.slane %v304_v31, %v194_v26 }
 0x140   :  { %v199_v35 = vmax.f32 %v198_v32, 0.0  ;;  %v324_v36 = vadd.f32 %v323_v33, %v75_v14 }
 0x142   :  { %v200_v37 = vsub.f32 0.0, %v199_v35  ;;  %v326_v38 = vsub.f32 %v324_v36, %v325_v34 }
 0x144   :  { %v201_v39 = vmul.f32 1.442695, %v200_v37  ;;  %v327_v40 = vmax.f32 %v326_v38, 0.0 }
 0x146   :  { %412 = vpow2.f32 %v201_v39  ;;  %v328_v41 = vsub.f32 0.0, %v327_v40 }
 0x148   :  { %v329_v42 = vmul.f32 1.442695, %v328_v41 }
 0x14a   :  { %414 = vpow2.f32 %v329_v42 }
 0x150   :  { %v413_v43 = vpop.eup %412 }
 0x151   :  { %v204_v44 = vsel %vm203_vm3, %v413_v43, 0.0 }
 0x152   :  { %205 = vadd.xlane.f32.xlu1 %v204_v44 }
 0x154   :  { %v415_v45 = vpop.eup %414 }
 0x155   :  { %v331_v46 = vsel %vm203_vm3, %v415_v45, 0.0 }
 0x156   :  { %332 = vadd.xlane.f32.xlu0 %v331_v46 }
 0x173   :  { %v63_v47 = vpop.xlane.xlu0 %62 }
 0x174   :  { %v64_v48 = vrot.slane %v63_v47, 4 }
 0x176   :  { %v65_v49 = vadd.f32 %v64_v48, %v63_v47 }
 0x178   :  { %v66_v50 = vrot.slane %v65_v49, 2 }
 0x17a   :  { %v67_v51 = vadd.f32 %v66_v50, %v65_v49 }
 0x17c   :  { %v68_v52 = vrot.slane %v67_v51, 1 }
 0x17e   :  { %v69_v53 = vadd.f32 %v68_v52, %v67_v51 }
 0x180   :  { %399 = vpush %v69_v53 }
 0x1b1   :  { %s400_s1 = spop %399 }
 0x1b2   :  { %v71_v55 = vstv %s400_s1 }
 0x1b3   :  { %v343_v56 = vadd.f32 %v342_v54, %v71_v55 }
 0x1b5   :  { %345 = vst.msk [vmem:[#allocation2] sm:$0x1] %vm40_vm4, %v343_v56 }
 0x1bc   :  { %v355_v14 = vld [vmem:[#allocation2] sm:$0x1] }
 0x1bd   :  { %v357_v15 = vmul.f32 0.125, %v355_v14 }
 0x1bf   :  { %v358_v17 = vsub.f32 1.0, %v357_v15 }
 0x1df   :  { %v206_v57 = vpop.xlane.xlu1 %205 }
 0x1e0   :  { %v207_v58 = vrot.slane %v206_v57, 4 }
 0x1e2   :  { %v208_v59 = vadd.f32 %v207_v58, %v206_v57 }
 0x1e3   :  { %v333_v60 = vpop.xlane.xlu0 %332 }
 0x1e4   :  { %v209_v61 = vrot.slane %v208_v59, 2  ;;  %v334_v62 = vrot.slane %v333_v60, 4 }
 0x1e6   :  { %v210_v63 = vadd.f32 %v209_v61, %v208_v59  ;;  %v335_v0 = vadd.f32 %v334_v62, %v333_v60 }
 0x1e8   :  { %v336_v1 = vrot.slane %v335_v0, 2  ;;  %v211_v2 = vrot.slane %v210_v63, 1 }
 0x1ea   :  { %v337_v3 = vadd.f32 %v336_v1, %v335_v0  ;;  %v212_v4 = vadd.f32 %v211_v2, %v210_v63 }
 0x1ec   :  { %401 = vpush %v212_v4  ;;  %v338_v5 = vrot.slane %v337_v3, 1 }
 0x1ee   :  { %v339_v6 = vadd.f32 %v338_v5, %v337_v3 }
 0x1f0   :  { %403 = vpush %v339_v6 }
 0x21d   :  { %s402_s4 = spop %401 }
 0x21e   :  { %v214_v7 = vstv %s402_s4 }
 0x21f   :  { %v347_v9 = vsub.f32 %v214_v7, %v71_v55 }
 0x221   :  { %s404_s5 = spop %403 }
 0x222   :  { %v341_v8 = vstv %s404_s5 }
 0x223   :  { %v384_v10 = vadd.f32 -8.0, %v341_v8 }
 0x225   :  { %v349_v12 = vadd.f32 %v384_v10, %v347_v9 }
 0x227   :  { %v350_v13 = vadd.f32 %v349_v12, %v346_v11 }
 0x229   :  { %351 = vst.msk [vmem:[#allocation3] sm:$0x1] %vm40_vm4, %v350_v13 }
 0x230   :  { %v359_v16 = vld [vmem:[#allocation3] sm:$0x1] }
 0x231   :  { %v361_v18 = vmul.f32 0.017857144, %v359_v16 }
 0x233   :  { %v362_v19 = vadd.f32 %v361_v18, %v358_v17 }
 0x235   :  { %363 = vst.msk [vmem:[#allocation9] sm:$0x1] %vm40_vm4, %v362_v19 }
 0x236   :  { %471 = shalt.err (!%p468_p6)
}
 0x237   :  { %s472_s12 = scalar_lea.hbm %s557_s2, 16 }
 0x238   :  { %p473_p7 = scmp.ne.s32.totalorder %s557_s2, %s472_s12  ;;  %p476_p8 = scmp.lt.u32.totalorder %s472_s12, %s557_s2 }
 0x23a   :  { %p478_p9 = pnand %p476_p8, %p473_p7 }
 0x23c   :  { %481 = shalt.err (!%p478_p9)
}
 0x23d   :  { %373 = dma.vmem_to_hbm [thread:$0]  %s371_s7, 16, %s557_s2, [#allocation6]  }
 0x23e   :  { %486 = dma.done.wait [#allocation6], 16  }
 0x23f   :  { %487 = vsyncadd [#allocation6], 4294967280 }
 0x240   :  { %377 = vsyncpa [#allocation5], 1 }
 0x241   :  { %378 = vsyncpa [#allocation8], 1 }
 0x242   :  { %379 = vsyncpa [#allocation6], 1 }

</bundles_post_ra>
